<compile_context>
chip_gen: v5e
topology: v5e:2x2
jax: 0.10.0
libtpu: 0.0.40
codegen_flags: <defaults>
</compile_context>

<pallas_src>
import functools

import jax
import jax.numpy as jnp
from jax import lax
from jax.experimental import pallas as pl
from jax.experimental.pallas import tpu as pltpu

EPS = 1e-5          # nn.InstanceNorm2d default eps
NEG_SLOPE = 0.01    # F.leaky_relu default negative_slope
HIGHEST = lax.Precision.HIGHEST


def _vmem_capacity_bytes():
    try:
        return int(pltpu.get_tpu_info().vmem_capacity_bytes)
    except Exception:
        return 64 * 2 ** 20   # conservative fallback (v7x has the smallest VMEM)


def _clamp_vmem_limit(need_bytes, cap):
    return int(max(32 * 2 ** 20, min(need_bytes, cap - 16 * 2 ** 20)))


# ---------------------------------------------------------------------------
# Fused: 3x3 (dilated) conv + InstanceNorm2d + (residual) + leaky_relu
# ---------------------------------------------------------------------------
def _conv3x3_in_lrelu_kernel(x_ref, w_ref, mask_ref, *rest,
                             d, row_stride, out_len, inv_n, has_residual):
    # x_ref   : (1, C_in, Np)      zero-padded, spatially flattened input (bf16)
    # w_ref   : (C_blk, 9*C_in)    stacked weights, rows ordered (kx, ky, c_in)
    # mask_ref: (1, out_len)       1.0 on valid pixels, 0.0 on pad columns
    # res_ref : (1, C_blk, out_len) residual slab (f32), optional
    # o_ref   : (1, C_blk, out_len) output slab (row stride = row_stride)
    if has_residual:
        res_ref, o_ref = rest
    else:
        (o_ref,) = rest

    L = out_len
    x = x_ref[0]                                            # (C_in, Np) bf16
    s = d * row_stride

    # kx = 0 taps of the three kernel rows (ky = 0,1,2), stacked on sublanes.
    base = jnp.concatenate(
        [x[:, 0:L], x[:, s:s + L], x[:, 2 * s:2 * s + L]], axis=0)  # (3*C_in, L)

    def lshift(a, k):
        # a[:, j] <- a[:, (j + k) % L]; the k wrapped columns land only in
        # masked (invalid) pad columns of the last image row.
        return jnp.concatenate([a[:, k:], a[:, :k]], axis=1)

    # Stacked operand: rows ordered (kx, ky, c_in) to match w_ref.
    xs = jnp.concatenate([base, lshift(base, d), lshift(base, 2 * d)], axis=0)

    # Single deep MXU matmul in native bf16, f32 accumulation.
    # (Conv bias omitted: it cancels exactly under InstanceNorm2d, affine=False.)
    acc = jnp.dot(w_ref[...], xs, preferred_element_type=jnp.float32)

    # InstanceNorm2d: masked single-pass statistics (biased variance), f32.
    m = mask_ref[...]                                       # (1, L)
    am = acc * m
    mean = jnp.sum(am, axis=1, keepdims=True) * inv_n
    ex2 = jnp.sum(am * acc, axis=1, keepdims=True) * inv_n
    var = jnp.maximum(ex2 - mean * mean, 0.0)
    y = (acc - mean) * lax.rsqrt(var + EPS)                 # rsqrt -> EUP slot

    if has_residual:
        y = y + res_ref[0]
    o_ref[0] = jnp.maximum(y, NEG_SLOPE * y).astype(o_ref.dtype)   # leaky_relu


def conv3x3_in_lrelu(x, w, *, dilation=1, residual=None):
    """leaky_relu(InstanceNorm2d(conv3x3(x, dilation)) [+ residual]).

    x: (B, C_in, H, W); w: (C_out, C_in, 3, 3); residual: optional (B, C_out, H, W).
    Returns (B, C_out, H, W) float32.
    """
    B, C_in, H, W = x.shape
    C_out = w.shape[0]
    d = int(dilation)
    Hp, Wp = H + 2 * d, W + 2 * d
    out_len = H * Wp                   # output slab: H rows, row stride Wp
    Np = Hp * Wp                       # flattened padded input

    # Padded, flattened, bf16 conv operand (matmul path only; residual stays f32).
    xp = jnp.pad(x.astype(jnp.float32),
                 ((0, 0), (0, 0), (d, d), (d, d))).reshape(B, C_in, Np)
    xp = xp.astype(jnp.bfloat16)

    # Stacked weights (C_out, 9*C_in) bf16, contraction rows ordered (kx, ky, c_in).
    w9 = jnp.transpose(w.astype(jnp.float32), (0, 3, 2, 1)).reshape(C_out, 9 * C_in)
    w9 = w9.astype(jnp.bfloat16)

    # Precomputed valid-pixel mask (avoids per-step in-kernel vector modulo).
    col = jnp.arange(out_len, dtype=jnp.int32) % Wp
    mask = (col < W).astype(jnp.float32).reshape(1, out_len)

    has_res = residual is not None
    cap = _vmem_capacity_bytes()

    def est(cb):                       # rough per-step VMEM working set (bytes)
        io = 2 * (2 * C_in * Np + 2 * cb * 9 * C_in + 4 * out_len
                  + 4 * cb * out_len * (2 if has_res else 1))
        tmp = 48 * C_in * out_len + 12 * cb * out_len
        return io + tmp + (2 << 20)

    cands = [c for c in range(C_out, 0, -1)
             if C_out % c == 0 and (c == C_out or c % 8 == 0)]
    budget = int(0.6 * cap)
    c_block = next((c for c in cands if est(c) <= budget), cands[-1])
    if B == 1:                         # keep both v7x TensorCores busy at B == 1
        smaller = [c for c in cands if c < c_block and est(c) <= budget]
        if smaller:
            c_block = smaller[0]
    n_cblk = C_out // c_block
    vmem_limit = _clamp_vmem_limit(est(c_block) + (8 << 20), cap)

    inputs = [xp, w9, mask]
    in_specs = [
        pl.BlockSpec((1, C_in, Np), lambda i, j: (i, 0, 0)),
        pl.BlockSpec((c_block, 9 * C_in), lambda i, j: (j, 0)),
        pl.BlockSpec((1, out_len), lambda i, j: (0, 0)),
    ]
    if has_res:
        resp = jnp.pad(residual.astype(jnp.float32),
                       ((0, 0), (0, 0), (0, 0), (0, Wp - W))).reshape(B, C_out, out_len)
        inputs.append(resp)
        in_specs.append(pl.BlockSpec((1, c_block, out_len), lambda i, j: (i, j, 0)))

    kernel = functools.partial(
        _conv3x3_in_lrelu_kernel, d=d, row_stride=Wp, out_len=out_len,
        inv_n=1.0 / float(H * W), has_residual=has_res)

    out = pl.pallas_call(
        kernel,
        out_shape=jax.ShapeDtypeStruct((B, C_out, out_len), jnp.float32),
        grid_spec=pltpu.PrefetchScalarGridSpec(
            num_scalar_prefetch=0,
            grid=(B, n_cblk),
            in_specs=in_specs,
            out_specs=pl.BlockSpec((1, c_block, out_len), lambda i, j: (i, j, 0)),
        ),
        compiler_params=pltpu.CompilerParams(
            dimension_semantics=("parallel", "parallel"),
            vmem_limit_bytes=vmem_limit),
    )(*inputs)

    # Drop the 2*d padding columns of each row -> NCHW (reshape is free).
    # TODO(synk): chain stages in the padded slab layout (zeroed halo) to avoid
    # this XLA slice + next-stage re-pad HBM round trip.
    return out.reshape(B, C_out, H, Wp)[:, :, :, :W]


# ---------------------------------------------------------------------------
# 2x2 / stride-2 max pool
# ---------------------------------------------------------------------------
def _maxpool2x2_kernel(x_ref, se_ref, o_ref, *, width):
    # x_ref : (1, rows, 2W)   row r = [image row 2i | image row 2i+1]
    # se_ref: (W, Wo)         one-hot even-column selector
    # o_ref : (1, rows, Wo)
    x = x_ref[0]
    v = jnp.maximum(x[:, :width], x[:, width:])              # vertical 2-max
    vn = jnp.concatenate([v[:, 1:], v[:, :1]], axis=1)       # neighbour v[j+1]
    m = jnp.maximum(v, vn)                                   # m[j] = max(v[j], v[j+1])
    # Exact even-column selection (one-hot matmul; HIGHEST keeps f32 exact).
    o_ref[0] = jnp.dot(m, se_ref[...], preferred_element_type=jnp.float32,
                       precision=HIGHEST).astype(o_ref.dtype)


def maxpool2x2(x):
    B, C, H, W = x.shape
    assert H % 2 == 0 and W % 2 == 0, "MaxPool2d(2,2) path assumes even H, W"
    Ho, Wo = H // 2, W // 2

    xv = x.astype(jnp.float32).reshape(B, C * Ho, 2 * W)     # free reshape
    se = (jnp.arange(W)[:, None] == 2 * jnp.arange(Wo)[None, :]).astype(jnp.float32)

    cap = _vmem_capacity_bytes()

    def est(cb):
        rows = cb * Ho
        return (2 * (rows * 2 * W * 4 + W * Wo * 4 + rows * Wo * 4)
                + 3 * rows * W * 4 + (1 << 20))

    cands = [c for c in range(C, 0, -1)
             if C % c == 0 and (c == C or (c * Ho) % 8 == 0)]
    budget = int(0.5 * cap)
    cb = next((c for c in cands if est(c) <= budget), cands[-1])
    # Prefer >=2 channel blocks so both v7x TensorCores stay busy.
    smaller = [c for c in cands if c < cb and est(c) <= budget]
    if cb == C and smaller:
        cb = smaller[0]
    n_cb = C // cb
    vmem_limit = _clamp_vmem_limit(est(cb) + (8 << 20), cap)

    kernel = functools.partial(_maxpool2x2_kernel, width=W)
    out = pl.pallas_call(
        kernel,
        out_shape=jax.ShapeDtypeStruct((B, C * Ho, Wo), jnp.float32),
        grid_spec=pltpu.PrefetchScalarGridSpec(
            num_scalar_prefetch=0,
            grid=(B, n_cb),
            in_specs=[pl.BlockSpec((1, cb * Ho, 2 * W), lambda i, j: (i, j, 0)),
                      pl.BlockSpec((W, Wo), lambda i, j: (0, 0))],
            out_specs=pl.BlockSpec((1, cb * Ho, Wo), lambda i, j: (i, j, 0)),
        ),
        compiler_params=pltpu.CompilerParams(
            dimension_semantics=("parallel", "parallel"),
            vmem_limit_bytes=vmem_limit),
    )(xv, se)
    return out.reshape(B, C, Ho, Wo)


# ---------------------------------------------------------------------------
# ResDownNew forward
# ---------------------------------------------------------------------------
def res_down_new_forward(x, params, *, pooling=True, dilations=(1, 1, 1)):
    """ResDownNew.forward: returns (pooled_or_x2, before_pool)."""
    # Conv biases in `params` are accepted but unused by the kernels: a
    # per-channel constant cancels exactly under InstanceNorm2d (affine=False).
    x1 = conv3x3_in_lrelu(x, params["conv1_w"], dilation=1)
    for i, dd in enumerate(dilations):
        x1 = conv3x3_in_lrelu(x1, params["conv2_w"][i], dilation=dd, residual=x1)
    before_pool = x1
    out = maxpool2x2(before_pool) if pooling else before_pool
    return out, before_pool


# ---------------------------------------------------------------------------
# Pure-JAX reference (mirrors the PyTorch module)
# ---------------------------------------------------------------------------
def _leaky_relu_ref(y):
    return jnp.where(y >= 0, y, NEG_SLOPE * y)


def _instance_norm_ref(y):
    mean = jnp.mean(y, axis=(2, 3), keepdims=True)
    var = jnp.mean((y - mean) ** 2, axis=(2, 3), keepdims=True)
    return (y - mean) * lax.rsqrt(var + EPS)


def _conv3x3_ref(x, w, b, d, conv_dtype):
    prec = HIGHEST if conv_dtype == jnp.float32 else None
    y = lax.conv_general_dilated(
        x.astype(conv_dtype), w.astype(conv_dtype),
        window_strides=(1, 1), padding=((d, d), (d, d)), rhs_dilation=(d, d),
        dimension_numbers=("NCHW", "OIHW", "NCHW"),
        preferred_element_type=jnp.float32, precision=prec)
    return y + b[None, :, None, None].astype(jnp.float32)


def res_down_new_reference(x, params, *, pooling=True, dilations=(1, 1, 1),
                           conv_dtype=jnp.float32):
    x1 = _leaky_relu_ref(_instance_norm_ref(
        _conv3x3_ref(x, params["conv1_w"], params["conv1_b"], 1, conv_dtype)))
    for i, dd in enumerate(dilations):
        x2 = _conv3x3_ref(x1, params["conv2_w"][i], params["conv2_b"][i], dd, conv_dtype)
        x2 = _instance_norm_ref(x2) + x1
        x1 = _leaky_relu_ref(x2)
    before_pool = x1
    if pooling:
        B, C, H, W = before_pool.shape
        out = before_pool.reshape(B, C, H // 2, 2, W // 2, 2).max(axis=(3, 5))
    else:
        out = before_pool
    return out, before_pool


if __name__ == "__main__":
    key = jax.random.PRNGKey(0)
    ks = jax.random.split(key, 9)
    B, C_in, C_out, H, W = 2, 4, 8, 16, 16

    x = jax.random.normal(ks[0], (B, C_in, H, W), dtype=jnp.float32)
    params = {
        "conv1_w": 0.2 * jax.random.normal(ks[1], (C_out, C_in, 3, 3), jnp.float32),
        "conv1_b": 0.1 * jax.random.normal(ks[2], (C_out,), jnp.float32),
        "conv2_w": [0.2 * jax.random.normal(ks[3 + i], (C_out, C_out, 3, 3),
                                            jnp.float32) for i in range(3)],
        "conv2_b": [0.1 * jax.random.normal(ks[6 + i], (C_out,), jnp.float32)
                    for i in range(3)],
    }

    pooled, before_pool = res_down_new_forward(x, params)
    pooled = jax.block_until_ready(pooled)
    before_pool = jax.block_until_ready(before_pool)

    assert pooled.shape == (B, C_out, H // 2, W // 2)
    assert before_pool.shape == (B, C_out, H, W)

    # Tight check against a reference that uses the same bf16 MXU operand
    # rounding as the kernels (differences come only from f32 accumulation
    # order and ulp-level cascade effects).
    ref_p_bf, ref_b_bf = res_down_new_reference(x, params, conv_dtype=jnp.bfloat16)
    err_b = float(jnp.max(jnp.abs(before_pool - ref_b_bf)))
    err_p = float(jnp.max(jnp.abs(pooled - ref_p_bf)))
    mean_b = float(jnp.mean(jnp.abs(before_pool - ref_b_bf)))
    assert err_b < 2.5e-2, ("before_pool mismatch vs bf16 reference", err_b)
    assert err_p < 2.5e-2, ("pooled mismatch vs bf16 reference", err_p)
    assert mean_b < 3e-3, ("before_pool mean mismatch vs bf16 reference", mean_b)

    # Loose sanity check vs the full-f32 reference (drift = bf16 MXU rounding,
    # largely washed out by InstanceNorm).
    _, ref_b32 = res_down_new_reference(x, params, conv_dtype=jnp.float32)
    drift = float(jnp.max(jnp.abs(before_pool - ref_b32)))
    assert drift < 0.3, ("excessive drift vs f32 reference", drift)

    print("KERNEL_OK")
</pallas_src>

<mosaic_0001>
module attributes {stable_mosaic.version = 11 : i64} {
  func.func @_conv3x3_in_lrelu_kernel(%arg0: i32, %arg1: i32, %arg2: memref<1x4x324xbf16, #tpu.memory_space<vmem>>, %arg3: memref<8x36xbf16, #tpu.memory_space<vmem>>, %arg4: memref<1x288xf32, #tpu.memory_space<vmem>>, %arg5: memref<1x8x288xf32, #tpu.memory_space<vmem>>) attributes {dimension_semantics = [#tpu.dimension_semantics<parallel>, #tpu.dimension_semantics<parallel>], iteration_bounds = array<i64: 2, 1>, scalar_prefetch = 0 : i64, scratch_operands = 0 : i64, tpu.core_type = #tpu.core_type<tc>, window_params = [{transform_indices = @transform_0, window_bounds = array<i64: 1, 4, 324>}, {transform_indices = @transform_1, window_bounds = array<i64: 8, 36>}, {pipeline_mode = #tpu.pipeline_mode<synchronous>, transform_indices = @transform_2, window_bounds = array<i64: 1, 288>}, {transform_indices = @transform_3, window_bounds = array<i64: 1, 8, 288>}]} {
    %c0 = arith.constant 0 : index
    %c0_0 = arith.constant 0 : index
    %c0_1 = arith.constant 0 : index
    %0 = vector.load %arg2[%c0, %c0_0, %c0_1] : memref<1x4x324xbf16, #tpu.memory_space<vmem>>, vector<1x4x324xbf16>
    %1 = vector.shape_cast %0 : vector<1x4x324xbf16> to vector<4x324xbf16>
    %2 = vector.extract_strided_slice %1 {offsets = [0, 0], sizes = [4, 288], strides = [1, 1]} : vector<4x324xbf16> to vector<4x288xbf16>
    %3 = vector.extract_strided_slice %1 {offsets = [0, 18], sizes = [4, 288], strides = [1, 1]} : vector<4x324xbf16> to vector<4x288xbf16>
    %4 = vector.extract_strided_slice %1 {offsets = [0, 36], sizes = [4, 288], strides = [1, 1]} : vector<4x324xbf16> to vector<4x288xbf16>
    %5 = tpu.concatenate %2, %3, %4 in 0 : vector<4x288xbf16>, vector<4x288xbf16>, vector<4x288xbf16> -> vector<12x288xbf16>
    %6 = vector.extract_strided_slice %5 {offsets = [0, 1], sizes = [12, 287], strides = [1, 1]} : vector<12x288xbf16> to vector<12x287xbf16>
    %7 = vector.extract_strided_slice %5 {offsets = [0, 0], sizes = [12, 1], strides = [1, 1]} : vector<12x288xbf16> to vector<12x1xbf16>
    %8 = tpu.concatenate %6, %7 in 1 : vector<12x287xbf16>, vector<12x1xbf16> -> vector<12x288xbf16>
    %9 = vector.extract_strided_slice %5 {offsets = [0, 2], sizes = [12, 286], strides = [1, 1]} : vector<12x288xbf16> to vector<12x286xbf16>
    %10 = vector.extract_strided_slice %5 {offsets = [0, 0], sizes = [12, 2], strides = [1, 1]} : vector<12x288xbf16> to vector<12x2xbf16>
    %11 = tpu.concatenate %9, %10 in 1 : vector<12x286xbf16>, vector<12x2xbf16> -> vector<12x288xbf16>
    %12 = tpu.concatenate %5, %8, %11 in 0 : vector<12x288xbf16>, vector<12x288xbf16>, vector<12x288xbf16> -> vector<36x288xbf16>
    %c0_2 = arith.constant 0 : index
    %c0_3 = arith.constant 0 : index
    %13 = vector.load %arg3[%c0_2, %c0_3] : memref<8x36xbf16, #tpu.memory_space<vmem>>, vector<8x36xbf16>
    %cst = arith.constant dense<0.000000e+00> : vector<8x288xf32>
    %14 = tpu.matmul %13, %12, %cst {dimension_numbers = #tpu.dot_dimension_numbers<[1], [0], [0], [1], [0, 0, 1, 1], [], []>} : vector<8x36xbf16>, vector<36x288xbf16>, vector<8x288xf32> -> vector<8x288xf32>
    %c0_4 = arith.constant 0 : index
    %c0_5 = arith.constant 0 : index
    %15 = vector.load %arg4[%c0_4, %c0_5] : memref<1x288xf32, #tpu.memory_space<vmem>>, vector<1x288xf32>
    %16 = vector.broadcast %15 : vector<1x288xf32> to vector<8x288xf32>
    %17 = arith.mulf %14, %16 : vector<8x288xf32>
    %cst_6 = arith.constant dense<0.000000e+00> : vector<8xf32>
    %18 = vector.multi_reduction <add>, %17, %cst_6 [1] : vector<8x288xf32> to vector<8xf32>
    %19 = vector.shape_cast %18 : vector<8xf32> to vector<8x1xf32>
    %cst_7 = arith.constant 3.906250e-03 : f32
    %20 = vector.broadcast %cst_7 : f32 to vector<8x1xf32>
    %21 = arith.mulf %19, %20 : vector<8x1xf32>
    %22 = arith.mulf %17, %14 : vector<8x288xf32>
    %cst_8 = arith.constant dense<0.000000e+00> : vector<8xf32>
    %23 = vector.multi_reduction <add>, %22, %cst_8 [1] : vector<8x288xf32> to vector<8xf32>
    %24 = vector.shape_cast %23 : vector<8xf32> to vector<8x1xf32>
    %cst_9 = arith.constant 3.906250e-03 : f32
    %25 = vector.broadcast %cst_9 : f32 to vector<8x1xf32>
    %26 = arith.mulf %24, %25 : vector<8x1xf32>
    %27 = arith.mulf %21, %21 : vector<8x1xf32>
    %28 = arith.subf %26, %27 : vector<8x1xf32>
    %cst_10 = arith.constant 0.000000e+00 : f32
    %29 = vector.broadcast %cst_10 : f32 to vector<8x1xf32>
    %30 = arith.maximumf %28, %29 : vector<8x1xf32>
    %31 = vector.broadcast %21 : vector<8x1xf32> to vector<8x288xf32>
    %32 = arith.subf %14, %31 : vector<8x288xf32>
    %cst_11 = arith.constant 9.99999974E-6 : f32
    %33 = vector.broadcast %cst_11 : f32 to vector<8x1xf32>
    %34 = arith.addf %30, %33 : vector<8x1xf32>
    %35 = math.rsqrt %34 : vector<8x1xf32>
    %36 = vector.broadcast %35 : vector<8x1xf32> to vector<8x288xf32>
    %37 = arith.mulf %32, %36 : vector<8x288xf32>
    %cst_12 = arith.constant 0.00999999977 : f32
    %38 = vector.broadcast %cst_12 : f32 to vector<8x288xf32>
    %39 = arith.mulf %38, %37 : vector<8x288xf32>
    %40 = arith.maximumf %37, %39 : vector<8x288xf32>
    %c0_13 = arith.constant 0 : index
    %c0_14 = arith.constant 0 : index
    %c0_15 = arith.constant 0 : index
    %41 = vector.load %arg5[%c0_13, %c0_14, %c0_15] : memref<1x8x288xf32, #tpu.memory_space<vmem>>, vector<1x8x288xf32>
    %42 = vector.shape_cast %41 : vector<1x8x288xf32> to vector<8x288xf32>
    %43 = vector.shape_cast %40 : vector<8x288xf32> to vector<1x8x288xf32>
    tpu.vector_store %arg5[%c0_13, %c0_14, %c0_15], %43 {strides = array<i32>} : memref<1x8x288xf32, #tpu.memory_space<vmem>>, vector<1x8x288xf32>,
    return
  }
  func.func @transform_0(%arg0: i32, %arg1: i32) -> (i32, i32, i32) {
    %c0_i32 = arith.constant 0 : i32
    %c0_i32_0 = arith.constant 0 : i32
    %c0_i32_1 = arith.constant 0 : i32
    return %arg0, %c0_i32, %c0_i32_0 : i32, i32, i32
  }
  func.func @transform_1(%arg0: i32, %arg1: i32) -> (i32, i32) {
    %c0_i32 = arith.constant 0 : i32
    %c0_i32_0 = arith.constant 0 : i32
    return %arg1, %c0_i32 : i32, i32
  }
  func.func @transform_2(%arg0: i32, %arg1: i32) -> (i32, i32) {
    %c0_i32 = arith.constant 0 : i32
    %c0_i32_0 = arith.constant 0 : i32
    %c0_i32_1 = arith.constant 0 : i32
    return %c0_i32, %c0_i32_0 : i32, i32
  }
  func.func @transform_3(%arg0: i32, %arg1: i32) -> (i32, i32, i32) {
    %c0_i32 = arith.constant 0 : i32
    %c0_i32_0 = arith.constant 0 : i32
    return %arg0, %arg1, %c0_i32 : i32, i32, i32
  }
}

</mosaic_0001>

<bundles_post_ra>
// kernel: tpu_custom_call.1
= control target key start
LH: loop header
LB: loop body
LE: loop exit
PB: predicated region body
PF: predicated region fallthrough
CT: control target
= control target key end

     0   :  { %8 = vsyncpa [#allocation3], 0  ;;  %s1069_s0 = inlined_call_operand.hbm [shape: bf16[2,4,324], index: 0, kind: input, shape index: {}]   ;;  %s1070_s1 = inlined_call_operand.hbm [shape: bf16[8,36], index: 1, kind: input, shape index: {}]   ;;  %s1071_s2 = inlined_call_operand.hbm [shape: f32[1,288], index: 2, kind: input, shape index: {}]   ;;  %s1072_s3 = inlined_call_operand.hbm [shape: f32[2,8,288], index: 3, kind: output, shape index: {}]  }
   0x1   :  { %10 = vsyncpa [#allocation3 + $0x1], 0 }
   0x2   :  { %11 = vsyncpa [#allocation6], 0 }
   0x3   :  { %12 = vsyncpa [#allocation4], 0 }
   0x4   :  { %14 = vsyncpa [#allocation4 + $0x1], 0  ;;  %s899_s12 = smov 0   ;;  %s901_s13 = smov 0  }
   0x5   :  { %s903_s14 = smov 0   ;;  %s905_s15 = smov 0  }
   0x6   :  { %s907_s16 = smov 0   ;;  %s909_s17 = smov 0  }
   0x7 LB: > { %s581_s18 = sadd.s32 4294967295, %s869_s17   ;;  %s582_s19 = sadd.s32 4294967294, %s869_s17   ;;  %s869_s17 = sphi %s909_s17, %s20_s17   ;;  %s865_s16 = sphi %s907_s16, %s1083_s16   ;;  %s861_s15 = sphi %s905_s15, %s1082_s15   ;;  %s857_s14 = sphi %s903_s14, %s1081_s14   ;;  %s853_s13 = sphi %s901_s13, %s1080_s13   ;;  %s849_s12 = sphi %s899_s12, %s1079_s12  }
   0x8   : > { %p52_p0 = scmp.ne.s32.totalorder %s853_s13, %s849_s12  ;;  %p933_p1 = scmp.eq.s32.totalorder %s581_s18, 0 }
   0x9   : > { %p937_p2 = scmp.eq.s32.totalorder %s581_s18, 1  ;;  %p131_p3 = scmp.eq.s32.totalorder %s582_s19, 1 }
   0xa   : > { %p943_p4 = por %p933_p1, %p52_p0  ;;  %p583_p5 = scmp.ge.s32.totalorder %s869_s17, 1 }
   0xb   : > { %p948_p6 = por %p131_p3, %p52_p0  ;;  %p138_p7 = scmp.lt.s32.totalorder %s869_s17, 3 }
   0xc   : > { %s152_s26 = sshll.u32 %s1070_s1, 4  ;;  %p586_p9 = scmp.ge.s32.totalorder %s869_s17, 2  ;;  %s153_s26 = int_to_ptr.hbm [resolvable:$true] %s152_s26 }
   0xd   : > { %p956_p8 = pnand %p583_p5, %p138_p7  ;;  %s871_s28 = smov [#allocation5]  }
   0xe   : > { %s154_s29 = sshll.u32 %s871_s28, 4  ;;  %s164_s5 = sshll.u32 %s1071_s2, 4  ;;  %s155_s29 = int_to_ptr.vmem [resolvable:$true] %s154_s29  ;;  %s165_s5 = int_to_ptr.hbm [resolvable:$true] %s164_s5 }
   0xf   : > { %p614_p10 = pneg %p956_p8  ;;  %s872_s6 = smov [#allocation7]  }
  0x10   : > { %s166_s7 = sshll.u32 %s872_s6, 4  ;;  %s32_s8 = sadd.s32 1, %s865_s16  ;;  %s167_s7 = int_to_ptr.vmem [resolvable:$true] %s166_s7 }
  0x11   : > { %p615_p11 = pnand %p614_p10, %p933_p1  ;;  %s39_s9 = sadd.s32 1, %s857_s14 }
  0x12   : > { %p34_p12 = scmp.ge.s32.totalorder %s32_s8, 2  ;;  %p46_p13 = scmp.ne.s32.totalorder %s857_s14, %s853_s13 }
  0x13   : > { %617 = dma.hbm_to_vmem [thread:$0]  (!%p615_p11), %s153_s26, 64, %s155_s29, [#allocation6]  }
  0x14   : > { %620 = dma.hbm_to_vmem [thread:$0]  (!%p615_p11), %s165_s5, 48, %s167_s7, [#allocation6]  }
  0x15   : > { %p47_p0 = scmp.eq.s32.totalorder %s869_s17, 0  ;;  %p631_p3 = scmp.lt.s32.totalorder %s869_s17, 2 }
  0x16   : > { %s1085_s8 = smov (%p34_p12, %s32_s8), 0  ;;  %p978_p7 = por %p937_p2, %p46_p13 }
  0x17   : > { %p48_p5 = por %p47_p0, %p46_p13  ;;  %s36_s11 = ssub.s32 %s865_s16, %s1085_s8 }
  0x18   : > { %s177_s18 = sand.u32 1, %s857_s14   ;;  %p37_p10 = scmp.eq.s32.totalorder %s36_s11, 0 }
  0x19   : > { %s597_s19 = smul.u32 6, %s177_s18  ;;  %p622_p11 = pnand %p631_p3, %p48_p5 }
  0x1a   : > { %s986_s24 = scalar_select %p37_p10, %s857_s14, %s39_s9  }
  0x1b   : > { %s598_s25 = smul.u32 6, %s865_s16  ;;  %s181_s26 = scalar_lea.vmem [#allocation2], %s597_s19 }
  0x1c   : > { %s190_s28 = sshll.u32 %s181_s26, 4  ;;  %s178_s5 = scalar_lea.sflag [#allocation3], %s177_s18  ;;  %s191_s28 = int_to_ptr.vmem [resolvable:$true] %s190_s28 }
  0x1d   : > { %s186_s4 = scalar_lea.hbm %s1069_s0, %s598_s25  ;;  %199 = sbr.rel (%p956_p8) target bundleno = 612 (0x264), region = 32 }
  0x1e   : > { %s188_s21 = sshll.u32 %s186_s4, 4  ;;  %s995_s6 = sand.u32 (!%p956_p8), 1, %s853_s13   ;;  %s189_s21 = int_to_ptr.hbm [resolvable:$true] %s188_s21 }
  0x1f   : > { %624 = dma.hbm_to_vmem [thread:$0]  (!%p622_p11), %s189_s21, 96, %s191_s28, %s178_s5  }
  0x20   : > { %s599_s7 = smul.u32 (!%p956_p8), 6, %s995_s6  ;;  %s202_s9 = scalar_lea.sflag (!%p956_p8), [#allocation3], %s995_s6 }
  0x22   : > { %s205_s11 = scalar_lea.vmem [#allocation2], %s599_s7 }
  0x23   : > { %836 = dma.done.wait (%p943_p4), %s202_s9, 96  }
  0x24   : > { %838 = vsyncadd (%p943_p4), %s202_s9, 4294967200 }
  0x25   : > { %840 = dma.done.wait (%p933_p1), [#allocation6], 112  }
  0x26   : > { %842 = vsyncadd (%p933_p1), [#allocation6], 4294967184  ;;  %v240_v0 = vld [vmem:[%s205_s11] sm:$0x3f]  ;;  %s873_s27 = smov 110   ;;  %s874_s22 = smov 92  }
  0x27   : > { %242 = vst [vmem:[#allocation1] ss:$4 sm:$0xff] %v240_v0  ;;  %vm280_vm0 = vcmask 1041408   ;;  %vm287_vm1 = vcmask 1043456   ;;  %s875_s20 = smov 126   ;;  %s876_s18 = smov 127  }
  0x28   : > { %vm260_vm2 = vcmask 900096   ;;  %vm277_vm3 = vcmask 752640   ;;  %s877_s19 = smov 31   ;;  %s878_s25 = smov 30   ;;  %vm318_vm4 = vcmask 1031168   ;;  %vm308_vm5 = vcmask 252928  }
  0x29   : > { %vm323_vm6 = vcmask 244736   ;;  %vm335_vm7 = vcmask 1045504   ;;  %v354_v45 = vld [vmem:[#allocation5] sm:$0xf]  ;;  %vm355_vm8 = vcmask 293888   ;;  %vm303_vm9 = vcmask 1039360  }
  0x2a   : > { %v404_v56 = vld [vmem:[#allocation7] sm:$0x7]  ;;  %vm416_vm10 = vcmask 261120   ;;  %s600_s26 = smul.u32 24, %s995_s6  ;;  %s461_s7 = scalar_lea.sflag [#allocation4], %s995_s6 }
  0x2b   : > { %v408_v58 = vperm.slane %v404_v56, 2  ;;  %v406_v59 = vperm.slane %v404_v56, 0  ;;  %v407_v60 = vperm.slane %v404_v56, 1  ;;  %s601_s28 = smul.u32 24, %s861_s15 }
  0x2c   : > { %s238_s21 = scalar_lea.vmem [#allocation8], %s600_s26 }
  0x2d   : > { %s474_s4 = scalar_lea.hbm %s1072_s3, %s601_s28  ;;  %s476_s15 = sshll.u32 %s238_s21, 4  ;;  %s477_s15 = int_to_ptr.vmem [resolvable:$true] %s476_s15 }
  0x2e   : > { %v243_v1 = vld.sshfl [vmem:[#allocation1] sm:$0xff pattern:$0x73625140]  ;;  %v244_v2 = vld.sshfl [vmem:[#allocation1 + $0x8] sm:$0xff pattern:$0x73625140] }
  0x2f   : > { %v245_v3 = vld.sshfl [vmem:[#allocation1 + $0x10] sm:$0xff pattern:$0x73625140]  ;;  %s478_s5 = sshll.u32 %s474_s4, 4  ;;  %s479_s5 = int_to_ptr.hbm [resolvable:$true] %s478_s5 }
  0x30   : > { %247 = vst [vmem:[#allocation1 + $0x1] ss:$4 sm:$0xff] %v240_v0  ;;  %s797_s9 = sshra.s32 %s479_s5, 4  ;;  %s798_s9 = int_to_ptr.hbm [resolvable:$true] %s797_s9 }
  0x31   : > { %s799_s11 = scalar_lea.hbm %s798_s9, 24  ;;  %p804_p8 = scmp.lt.s32.totalorder %s798_s9, %s1072_s3 }
  0x32   : > { %p800_p1 = scmp.ne.s32.totalorder %s798_s9, %s799_s11 }
  0x34   : > { %p801_p2 = pnand %p800_p1, %p978_p7 }
  0x36   : > { %p802_p4 = pneg %p801_p2 }
  0x37   : > { %v252_v4 = vld.sshfl [vmem:[#allocation1 + $0x10] sm:$0xff pattern:$0x73625140]  ;;  %v248_v5 = vld.sshfl [vmem:[#allocation1] sm:$0xff pattern:$0x73625140] }
  0x38   : > { %258 = vrot.lane.b32.xlu1 %v252_v4, %s873_s27  ;;  %254 = vrot.lane.b32.xlu0 %v248_v5, %s873_s27  ;;  %v250_v6 = vld.sshfl [vmem:[#allocation1 + $0x8] sm:$0xff pattern:$0x73625140] }
  0x39   : > { %264 = vst [vmem:[#allocation1 + $0x2] ss:$4 sm:$0xff] %v240_v0 }
  0x40   : > { %256 = vrot.lane.b32.xlu0 %v250_v6, %s873_s27  ;;  %v265_v7 = vld.sshfl [vmem:[#allocation1] sm:$0xff pattern:$0x73625140]  ;;  %v267_v8 = vld.sshfl [vmem:[#allocation1 + $0x8] sm:$0xff pattern:$0x73625140] }
  0x41   : > { %271 = vrot.lane.b32.xlu1 %v265_v7, %s874_s22  ;;  %273 = vrot.lane.b32.xlu2 %v267_v8, %s874_s22  ;;  %v269_v9 = vld.sshfl [vmem:[#allocation1 + $0x10] sm:$0xff pattern:$0x73625140] }
  0x49   : > { %275 = vrot.lane.b32.xlu2 %v269_v9, %s874_s22 }
  0x9b   : > { %v274_v10 = vpop.permute.xlu2 %273 }
  0xa3   : > { %v276_v11 = vpop.permute.xlu2 %275 }
  0xa4   : > { %v279_v20 = vsel %vm277_vm3, %v274_v10, %v276_v11 }
  0xaa   : > { %v259_v12 = vpop.permute.xlu1 %258  ;;  %v255_v13 = vpop.permute.xlu0 %254 }
  0xab   : > { %v286_v14 = vsel %vm280_vm0, %v245_v3, %v259_v12 }
  0xac   : > { %v293_v15 = vsel %vm287_vm1, %v286_v14, %v276_v11 }
  0xad   : > { %316 = vrot.lane.b32.xlu0 %v293_v15, %s875_s20  ;;  %301 = vrot.lane.b32.xlu2 %v293_v15, %s876_s18 }
  0xb2   : > { %v257_v16 = vpop.permute.xlu0 %256 }
  0xb3   : > { %v261_v17 = vsel %vm260_vm2, %v255_v13, %v257_v16  ;;  %v262_v18 = vsel %vm260_vm2, %v257_v16, %v259_v12  ;;  %v272_v19 = vpop.permute.xlu1 %271 }
  0xb4   : > { %v282_v21 = vsel %vm280_vm0, %v243_v1, %v261_v17  ;;  %v278_v22 = vsel %vm277_vm3, %v272_v19, %v274_v10  ;;  %v284_v23 = vsel %vm280_vm0, %v244_v2, %v262_v18 }
  0xb5   : > { %v289_v24 = vsel %vm287_vm1, %v282_v21, %v278_v22  ;;  %v291_v25 = vsel %vm287_vm1, %v284_v23, %v279_v20 }
  0xb6   : > { %314 = vrot.lane.b32.xlu2 %v291_v25, %s875_s20  ;;  %306 = vrot.lane.b32.xlu0 %v289_v24, %s877_s19 }
  0xb7   : > { %321 = vrot.lane.b32.xlu1 %v289_v24, %s878_s25 }
  0xbe   : > { %297 = vrot.lane.b32.xlu0 %v289_v24, %s876_s18 }
  0xbf   : > { %312 = vrot.lane.b32.xlu1 %v289_v24, %s875_s20  ;;  %s803_s20 = scalar_lea.hbm %s1072_s3, 48 }
  0xc0   : > { %p805_p12 = scmp.lt.s32.totalorder %s803_s20, %s799_s11 }
  0xc2   : > { %p806_p13 = por %p805_p12, %p804_p8 }
  0xc4   : > { %p807_p0 = pnand %p806_p13, %p802_p4 }
  0xc7   : > { %299 = vrot.lane.b32.xlu1 %v291_v25, %s876_s18 }
 0x107   : > { %v302_v26 = vpop.permute.xlu2 %301 }
 0x110   : > { %v315_v27 = vpop.permute.xlu2 %314 }
 0x11f   : > { %v317_v28 = vpop.permute.xlu0 %316 }
 0x120   : > { %v320_v29 = vsel %vm318_vm4, %v315_v27, %v317_v28 }
 0x121   : > { %v333_v30 = vrot.slane %v320_v29, 4 }
 0x123   : > { %v361_v31 = vsel %vm280_vm0, %v333_v30, 0 }
 0x124   : > { %383 = vmatpush.bf16.msra.mxu1 %v361_v31 }
 0x128   : > { %v307_v32 = vpop.permute.xlu0 %306 }
 0x129   : > { %v322_v33 = vpop.permute.xlu1 %321  ;;  %v311_v34 = vsel %vm308_vm5, %v302_v26, %v307_v32 }
 0x12a   : > { %v326_v35 = vsel %vm323_vm6, %v317_v28, %v322_v33  ;;  %v330_v37 = vrot.slane %v311_v34, 2 }
 0x12b   : > { %v334_v36 = vrot.slane %v326_v35, 4 }
 0x12c   : > { %v343_v44 = vsel %vm335_vm7, %v293_v15, %v330_v37 }
 0x12d   : > { %v363_v38 = vsel %vm280_vm0, %v334_v36, 0  ;;  %v352_v40 = vsel %vm287_vm1, %v330_v37, %v334_v36 }
 0x12e   : > { %396 = vmatpush.bf16.msra.mxu2 %v363_v38 }
 0x130   : > { %v298_v46 = vpop.permute.xlu0 %297 }
 0x131   : > { %v313_v39 = vpop.permute.xlu1 %312 }
 0x132   : > { %v319_v41 = vsel %vm318_vm4, %v313_v39, %v315_v27  ;;  %397 = vmatpush.bf16.msra.mxu2 %v352_v40 }
 0x133   : > { %v332_v42 = vrot.slane %v319_v41, 4 }
 0x135   : > { %v359_v43 = vsel %vm280_vm0, %v332_v42, 0 }
 0x136   : > { %370 = vmatpush.bf16.msra.mxu0 %v359_v43  ;;  %398 = vmatpush.bf16.msra.mxu2 %v343_v44 }
 0x139   : > { %593 = vmatmul.msk.bf16.vlgmr.msra.gmra.mxu2 %vm355_vm8, %v354_v45  ;;  %v300_v47 = vpop.permute.xlu1 %299 }
 0x13a   : > { %v304_v48 = vsel %vm303_vm9, %v298_v46, %v300_v47  ;;  %v305_v49 = vsel %vm303_vm9, %v300_v47, %v302_v26 }
 0x13b   : > { %v328_v50 = vrot.slane %v304_v48, 2  ;;  %v329_v51 = vrot.slane %v305_v49, 2 }
 0x13d   : > { %v346_v52 = vsel %vm287_vm1, %v328_v50, %v332_v42  ;;  %v349_v53 = vsel %vm287_vm1, %v329_v51, %v333_v30  ;;  %v337_v54 = vsel %vm335_vm7, %v289_v24, %v328_v50  ;;  %v340_v55 = vsel %vm335_vm7, %v291_v25, %v329_v51 }
 0x13e   : > { %371 = vmatpush.bf16.msra.mxu0 %v346_v52  ;;  %384 = vmatpush.bf16.msra.mxu1 %v349_v53 }
 0x142   : > { %372 = vmatpush.bf16.msra.mxu0 %v337_v54  ;;  %385 = vmatpush.bf16.msra.mxu1 %v340_v55 }
 0x145   : > { %591 = vmatmul.msk.bf16.vlgmr.msra.gmra.mxu0 %vm355_vm8, %v354_v45  ;;  %592 = vmatmul.msk.bf16.vlgmr.msra.gmra.mxu1 %vm355_vm8, %v354_v45 }
 0x1bc   : > { %v400_v57 = vpop.f32.mrf.mxu2 }
 0x1bd   : > { %v414_v61 = vmul.f32 %v408_v58, %v400_v57 }
 0x1bf   : > { %v424_v2 = vmul.f32 %v414_v61, %v400_v57  ;;  %v417_v4 = vsel %vm416_vm10, %v414_v61, 0.0 }
 0x1c1   : > { %v426_v10 = vsel %vm416_vm10, %v424_v2, 0.0 }
 0x1c2   : > { %v374_v62 = vpop.f32.mrf.mxu0  ;;  %v387_v63 = vpop.f32.mrf.mxu1 }
 0x1c3   : > { %v412_v0 = vmul.f32 %v406_v59, %v374_v62  ;;  %v413_v1 = vmul.f32 %v407_v60, %v387_v63 }
 0x1c4   : > { %v402_v3 = vpop.f32.mrf.mxu2 }
 0x1c5   : > { %v422_v5 = vmul.f32 %v412_v0, %v374_v62  ;;  %v423_v6 = vmul.f32 %v413_v1, %v387_v63  ;;  %v415_v7 = vadd.f32 %v413_v1, %v412_v0 }
 0x1c7   : > { %v418_v8 = vadd.f32 %v417_v4, %v415_v7  ;;  %v425_v9 = vadd.f32 %v423_v6, %v422_v5 }
 0x1c9   : > { %419 = vadd.xlane.f32.xlu2 %v418_v8  ;;  %v427_v11 = vadd.f32 %v426_v10, %v425_v9 }
 0x1ca   : > { %v376_v12 = vpop.f32.mrf.mxu0  ;;  %v389_v13 = vpop.f32.mrf.mxu1 }
 0x1cb   : > { %428 = vadd.xlane.f32.xlu0 %v427_v11 }
 0x23c   : > { %v420_v14 = vpop.xlane.xlu2 %419 }
 0x23d   : > { %v421_v15 = vmul.f32 0.00390625, %v420_v14 }
 0x23e   : > { %v429_v16 = vpop.xlane.xlu0 %428 }
 0x23f   : > { %v430_v17 = vmul.f32 0.00390625, %v429_v16  ;;  %v431_v18 = vmul.f32 %v421_v15, %v421_v15  ;;  %v434_v28 = vsub.f32 %v374_v62, %v421_v15  ;;  %v435_v29 = vsub.f32 %v387_v63, %v421_v15 }
 0x240   : > { %v436_v30 = vsub.f32 %v400_v57, %v421_v15 }
 0x241   : > { %v432_v19 = vsub.f32 %v430_v17, %v431_v18 }
 0x243   : > { %v433_v20 = vmax.f32 %v432_v19, 0.0 }
 0x245   : > { %v437_v21 = vadd.f32 1e-05, %v433_v20 }
 0x247   : > { %691 = vrsqrt.f32 %v437_v21  ;;  %vm444_vm12 = vweird.f32 %v437_v21 }
 0x24d   : > { %v692_v22 = vpop.eup %691 }
 0x24e   : > { %v439_v23 = vmul.f32 %v692_v22, %v437_v21  ;;  %vm445_vm11 = vweird.f32 %v692_v22 }
 0x24f   : > { %vm446_vm13 = vmor %vm444_vm12, %vm445_vm11 }
 0x250   : > { %v440_v24 = vmul.f32 %v692_v22, %v439_v23 }
 0x252   : > { %v441_v25 = vmul.f32 0.5, %v440_v24 }
 0x254   : > { %v442_v26 = vsub.f32 1.5, %v441_v25 }
 0x256   : > { %v443_v27 = vmul.f32 %v692_v22, %v442_v26 }
 0x258   : > { %v447_v31 = vsel %vm446_vm13, %v692_v22, %v443_v27 }
 0x259   : > { %v448_v32 = vmul.f32 %v447_v31, %v434_v28  ;;  %v449_v33 = vmul.f32 %v447_v31, %v435_v29  ;;  %v450_v34 = vmul.f32 %v447_v31, %v436_v30 }
 0x25b   : > { %v451_v35 = vmul.f32 0.01, %v448_v32  ;;  %v452_v36 = vmul.f32 0.01, %v449_v33  ;;  %v453_v37 = vmul.f32 0.01, %v450_v34 }
 0x25d   : > { %v454_v38 = vmax.f32 %v448_v32, %v451_v35  ;;  %v455_v39 = vmax.f32 %v449_v33, %v452_v36  ;;  %v456_v40 = vmax.f32 %v450_v34, %v453_v37 }
 0x25f   : > { %457 = vst [vmem:[%s238_s21] sm:$0xff] %v454_v38 }
 0x260   : > { %458 = vst [vmem:[%s238_s21 + $0x8] sm:$0xff] %v455_v39 }
 0x261   : > { %459 = vst.msk [vmem:[%s238_s21 + $0x10] sm:$0xff] %vm416_vm10, %v456_v40 }
 0x262   : > { %810 = shalt.err (!%p807_p0)
}
 0x263   : > { %612 = dma.vmem_to_hbm [thread:$0]  (%p978_p7), %s477_s15, 384, %s479_s5, %s461_s7  }
 0x264 PF: > { %s490_s6 = sand.u32 1, %s849_s12   ;;  %p626_p3 = pnand %p586_p9, %p948_p6 }
 0x265   : > { %s491_s25 = scalar_lea.sflag [#allocation4], %s490_s6 }
 0x266   : > { %p627_p5 = pneg %p626_p3 }
 0x268   : > { %844 = dma.done.wait (%p627_p5), %s491_s25, 384  }
 0x269   : > { %846 = vsyncadd (%p627_p5), %s491_s25, 4294966912  ;;  %s20_s17 = sadd.s32 1, %s869_s17   ;;  %s1079_s12 = smov %s853_s13 }
 0x26a   : > { %p17_p10 = scmp.ge.s32.totalorder %s20_s17, 4   ;;  %s1080_s13 = smov %s857_s14 }
 0x26b   : > { %s1081_s14 = smov %s986_s24  ;;  %s1082_s15 = smov %s865_s16 }
 0x26c   : > { %s1083_s16 = smov %s1085_s8  ;;  %19 = sbr.rel (!%p17_p10) target bundleno = 7 (0x7), region = 88 }
 0x271   :  { %497 = vsyncpa [#allocation3], 1 }
 0x272   :  { %499 = vsyncpa [#allocation3 + $0x1], 1 }
 0x273   :  { %500 = vsyncpa [#allocation6], 1 }
 0x274   :  { %501 = vsyncpa [#allocation4], 1 }
 0x275   :  { %503 = vsyncpa [#allocation4 + $0x1], 1 }

</bundles_post_ra>
